<compile_context>
chip_gen: v5e
topology: v5e:2x2
jax: 0.10.0
libtpu: 0.0.40
codegen_flags: <defaults>
</compile_context>

<pallas_src>
import jax
import jax.numpy as jnp
from jax import lax
from jax.experimental import pallas as pl
from jax.experimental.pallas import tpu as pltpu


# ---------------------------------------------------------------------------
# Path 1: VMEM-resident table + one-hot MXU gather (small vocabularies).
# ---------------------------------------------------------------------------
def _onehot_embed_kernel(idx_ref, w_ref, out_ref):
    ts = idx_ref.shape[0]          # tokens per tile
    v = w_ref.shape[0]             # vocabulary size
    idx = idx_ref[...]                                         # (TS, 1) int32
    iota_v = lax.broadcasted_iota(jnp.int32, (ts, v), 1)       # (TS, V)
    onehot = (iota_v == idx).astype(w_ref.dtype)               # (TS, V)
    # Gather == one matmul tile on the MXU (f32 accumulate).
    out_ref[...] = jnp.dot(
        onehot, w_ref[...], preferred_element_type=jnp.float32
    ).astype(out_ref.dtype)


# ---------------------------------------------------------------------------
# Path 2: table stays in HBM; manual multi-outstanding row-DMA gather.
# ---------------------------------------------------------------------------
def _make_hbm_gather_kernel(ts: int, nsem: int):
    def kernel(idx_smem, w_hbm, out_ref, sems):
        base = pl.program_id(0) * ts

        def start(t):
            row = idx_smem[base + t]                     # scalar read from SMEM
            pltpu.make_async_copy(
                w_hbm.at[pl.ds(row, 1), :],              # (1, D) table row (HBM)
                out_ref.at[pl.ds(t, 1), :],              # (1, D) output row (VMEM)
                sems.at[t % nsem],
            ).start()

        def wait(t):
            pltpu.make_async_copy(
                w_hbm.at[pl.ds(0, 1), :],                # shape-matching descriptor
                out_ref.at[pl.ds(t, 1), :],
                sems.at[t % nsem],
            ).wait()

        prime = min(nsem, ts)

        @pl.loop(0, prime)                               # keep `nsem` DMAs in flight
        def _prime(t):
            start(t)

        if ts > nsem:
            @pl.loop(nsem, ts)
            def _steady(t):
                wait(t - nsem)                           # frees sem slot t % nsem
                start(t)

        @pl.loop(max(ts - nsem, 0), ts)
        def _drain(t):
            wait(t)

    return kernel


def _physical_vmem_bytes() -> int:
    try:
        info = pltpu.get_tpu_info()
        cap = getattr(info, "vmem_capacity_bytes", None)
        if cap:
            return int(cap)
    except Exception:
        pass
    return 64 * 1024 * 1024   # conservative default (v7x per-TensorCore VMEM)


def pretrained_word_embedding(word_sequence: jax.Array, weight: jax.Array, *,
                              token_tile: int = 128,
                              max_onehot_vocab: int = 4096,
                              nsem: int = 16,
                              path: str = "auto") -> jax.Array:
    """Embedding lookup weight[word_sequence] as a Pallas TPU kernel."""
    (S,) = word_sequence.shape
    V, D = weight.shape
    dtype_bytes = jnp.dtype(weight.dtype).itemsize

    # nn.Embedding raises on out-of-range ids; we clamp so every
    # data-dependent DMA / one-hot row stays in bounds.
    idx = jnp.clip(word_sequence.astype(jnp.int32), 0, V - 1)

    # Token tile: at least 8 rows (dense sublanes, unmasked stores),
    # at most `token_tile` rows per grid step.
    if S >= token_tile:
        TS = token_tile
    else:
        TS = max(8, pl.cdiv(S, 8) * 8)
    num_tiles = pl.cdiv(S, TS)
    S_pad = num_tiles * TS
    if S_pad != S:
        idx = jnp.pad(idx, (0, S_pad - S))   # pad ids = 0 (valid row), dropped below

    # Generation-aware resident-table budget.
    table_bytes = V * D * dtype_bytes
    phys_vmem = _physical_vmem_bytes()
    vmem_budget = int(phys_vmem * 0.75)              # headroom under physical VMEM
    resident_need = (2 * table_bytes                  # (conservatively) double-buffered table
                     + 2 * TS * D * dtype_bytes       # double-buffered out tile
                     + TS * V * 4                     # one-hot working set
                     + 2 * TS * 4                     # index tile
                     + (4 << 20))                     # misc margin
    use_resident = (V <= max_onehot_vocab) and (resident_need <= vmem_budget)
    if path == "resident":
        use_resident = True
    elif path == "hbm":
        use_resident = False

    if use_resident:
        vmem_limit = int(min(vmem_budget, max(resident_need, 32 * 1024 * 1024)))
        out = pl.pallas_call(
            _onehot_embed_kernel,
            out_shape=jax.ShapeDtypeStruct((S_pad, D), weight.dtype),
            grid_spec=pltpu.PrefetchScalarGridSpec(
                num_scalar_prefetch=0,
                grid=(num_tiles,),
                in_specs=[
                    # (TS, 1) column of token ids for this tile.
                    pl.BlockSpec((TS, 1), lambda i: (i, 0)),
                    # Whole table; constant index -> fetched into VMEM once.
                    pl.BlockSpec((V, D), lambda i: (0, 0)),
                ],
                out_specs=pl.BlockSpec((TS, D), lambda i: (i, 0)),
            ),
            compiler_params=pltpu.CompilerParams(
                dimension_semantics=("parallel",),
                vmem_limit_bytes=vmem_limit,
            ),
        )(idx.reshape(S_pad, 1), weight)
    else:
        nsem_eff = max(1, min(nsem, TS))
        out = pl.pallas_call(
            _make_hbm_gather_kernel(TS, nsem_eff),
            out_shape=jax.ShapeDtypeStruct((S_pad, D), weight.dtype),
            grid_spec=pltpu.PrefetchScalarGridSpec(
                num_scalar_prefetch=1,                  # token ids -> SMEM
                grid=(num_tiles,),
                in_specs=[pl.BlockSpec(memory_space=pl.ANY)],   # table stays in HBM
                out_specs=pl.BlockSpec((TS, D), lambda i, idx_ref: (i, 0)),
                scratch_shapes=[pltpu.SemaphoreType.DMA((nsem_eff,))],
            ),
            compiler_params=pltpu.CompilerParams(
                dimension_semantics=("parallel",),
            ),
        )(idx, weight)

    return out[:S] if S_pad != S else out


def construct_weight_tensor(word_vocabulary, embedding_dimension, model):
    """JAX analogue of PreTrainedWordEmbeddingLayer.construct_weight_tensor."""
    key = jax.random.PRNGKey(1234)
    unknown_embedding = jax.random.uniform(key, (embedding_dimension,), dtype=jnp.float32)
    rows = [jnp.asarray(model.get(w, unknown_embedding), dtype=jnp.float32)
            for w in word_vocabulary]
    return jnp.stack(rows, axis=0)  # (V, D) float32


if __name__ == "__main__":
    key = jax.random.PRNGKey(0)
    k_model, k_idx, k_idx2, k_idx3 = jax.random.split(key, 4)

    # Small, deterministic synthetic setup.
    D = 128          # embedding (output) dimension — lane-aligned
    V = 32           # vocabulary size
    S = 8            # sequence length

    word_vocabulary = [f"word_{i}" for i in range(V)]
    # Deterministic "pre-trained model": only even-indexed words are known.
    known_vecs = jax.random.normal(k_model, (V, D), dtype=jnp.float32)
    model = {f"word_{i}": known_vecs[i] for i in range(0, V, 2)}
    weight = construct_weight_tensor(word_vocabulary, D, model)   # (V, D)

    # --- Path 1: VMEM-resident one-hot MXU gather (auto-selected: V=32) ----
    word_sequence = jax.random.randint(k_idx, (S,), 0, V, dtype=jnp.int32)
    out = pretrained_word_embedding(word_sequence, weight)
    out = jax.block_until_ready(out)
    ref = jnp.take(weight, word_sequence, axis=0)
    assert out.shape == (S, D) and out.dtype == weight.dtype
    assert bool(jnp.allclose(out, ref, atol=1e-6)), "resident-path mismatch"

    # --- Path 1b: multi-tile + padded tail (exercises grid > 1) ------------
    S3 = 200
    word_sequence3 = jax.random.randint(k_idx3, (S3,), 0, V, dtype=jnp.int32)
    out3 = pretrained_word_embedding(word_sequence3, weight)
    out3 = jax.block_until_ready(out3)
    ref3 = jnp.take(weight, word_sequence3, axis=0)
    assert out3.shape == (S3, D)
    assert bool(jnp.allclose(out3, ref3, atol=1e-6)), "multi-tile resident mismatch"

    # --- Path 2: force the HBM manual-DMA gather (used for large vocabs) ---
    S2 = 20
    word_sequence2 = jax.random.randint(k_idx2, (S2,), 0, V, dtype=jnp.int32)
    out2 = pretrained_word_embedding(word_sequence2, weight, path="hbm", nsem=4)
    out2 = jax.block_until_ready(out2)
    ref2 = jnp.take(weight, word_sequence2, axis=0)
    assert out2.shape == (S2, D)
    assert bool(jnp.allclose(out2, ref2)), "hbm-gather-path mismatch"

    print("KERNEL_OK")
</pallas_src>

<mosaic_0001>
module attributes {stable_mosaic.version = 11 : i64} {
  func.func @_onehot_embed_kernel(%arg0: i32, %arg1: memref<8x1xi32, #tpu.memory_space<vmem>>, %arg2: memref<32x128xf32, #tpu.memory_space<vmem>>, %arg3: memref<8x128xf32, #tpu.memory_space<vmem>>) attributes {dimension_semantics = [#tpu.dimension_semantics<parallel>], iteration_bounds = array<i64: 1>, scalar_prefetch = 0 : i64, scratch_operands = 0 : i64, tpu.core_type = #tpu.core_type<tc>, window_params = [{transform_indices = @transform_0, window_bounds = array<i64: 8, 1>}, {pipeline_mode = #tpu.pipeline_mode<synchronous>, transform_indices = @transform_1, window_bounds = array<i64: 32, 128>}, {transform_indices = @transform_2, window_bounds = array<i64: 8, 128>}]} {
    %c0 = arith.constant 0 : index
    %c0_0 = arith.constant 0 : index
    %0 = vector.load %arg1[%c0, %c0_0] : memref<8x1xi32, #tpu.memory_space<vmem>>, vector<8x1xi32>
    %1 = tpu.iota {dimensions = array<i32: 1>} : vector<8x32xi32>
    %2 = vector.broadcast %0 : vector<8x1xi32> to vector<8x32xi32>
    %3 = arith.cmpi eq, %1, %2 : vector<8x32xi32>
    %4 = arith.extui %3 : vector<8x32xi1> to vector<8x32xi32>
    %5 = arith.sitofp %4 : vector<8x32xi32> to vector<8x32xf32>
    %c0_1 = arith.constant 0 : index
    %c0_2 = arith.constant 0 : index
    %6 = vector.load %arg2[%c0_1, %c0_2] : memref<32x128xf32, #tpu.memory_space<vmem>>, vector<32x128xf32>
    %cst = arith.constant dense<0.000000e+00> : vector<8x128xf32>
    %7 = tpu.matmul %5, %6, %cst {dimension_numbers = #tpu.dot_dimension_numbers<[1], [0], [0], [1], [0, 0, 1, 1], [], []>} : vector<8x32xf32>, vector<32x128xf32>, vector<8x128xf32> -> vector<8x128xf32>
    %c0_3 = arith.constant 0 : index
    %c0_4 = arith.constant 0 : index
    %8 = vector.load %arg3[%c0_3, %c0_4] : memref<8x128xf32, #tpu.memory_space<vmem>>, vector<8x128xf32>
    tpu.vector_store %arg3[%c0_3, %c0_4], %7 {strides = array<i32>} : memref<8x128xf32, #tpu.memory_space<vmem>>, vector<8x128xf32>,
    return
  }
  func.func @transform_0(%arg0: i32) -> (i32, i32) {
    %c0_i32 = arith.constant 0 : i32
    %c0_i32_0 = arith.constant 0 : i32
    return %arg0, %c0_i32 : i32, i32
  }
  func.func @transform_1(%arg0: i32) -> (i32, i32) {
    %c0_i32 = arith.constant 0 : i32
    %c0_i32_0 = arith.constant 0 : i32
    %c0_i32_1 = arith.constant 0 : i32
    return %c0_i32, %c0_i32_0 : i32, i32
  }
  func.func @transform_2(%arg0: i32) -> (i32, i32) {
    %c0_i32 = arith.constant 0 : i32
    %c0_i32_0 = arith.constant 0 : i32
    return %arg0, %c0_i32 : i32, i32
  }
}

</mosaic_0001>

<bundles_post_ra>
// kernel: tpu_custom_call.1
= control target key start
LH: loop header
LB: loop body
LE: loop exit
PB: predicated region body
PF: predicated region fallthrough
CT: control target
= control target key end

     0   :  { %7 = vsyncpa [#allocation3], 0  ;;  %s174_s0 = inlined_call_operand.vmem [shape: s32[8,1], index: 0, kind: input, shape index: {}]   ;;  %s175_s1 = inlined_call_operand.hbm [shape: f32[32,128], index: 1, kind: input, shape index: {}]   ;;  %s176_s2 = inlined_call_operand.hbm [shape: f32[8,128], index: 2, kind: output, shape index: {}]  }
   0x1   :  { %8 = vsyncpa [#allocation4], 0  ;;  %s15_s11 = sshll.u32 %s175_s1, 4  ;;  %s144_s12 = smov [#allocation2]   ;;  %s16_s11 = int_to_ptr.hbm [resolvable:$true] %s15_s11 }
   0x2   :  { %s17_s13 = sshll.u32 %s144_s12, 4  ;;  %s145_s14 = smov 128   ;;  %s18_s13 = int_to_ptr.vmem [resolvable:$true] %s17_s13 }
   0x3   :  { %s146_s15 = smov 8  }
   0x4   :  { %23 = dma.hbm_to_vmem [thread:$0]  %s16_s11, 512, %s18_s13, [#allocation3], %s145_s14, %s145_s14, %s146_s15  }
   0x5   :  { %140 = dma.done.wait [#allocation3], 512  }
   0x6   :  { %141 = vsyncadd [#allocation3], 4294966784  ;;  %v147_v0 = vmov 0   ;;  %v28_v1 = vld [vmem:[%s174_s0] sm:$0xff]  ;;  %v40_v2 = vld [vmem:[#allocation2 + $0x18] sm:$0xff]  ;;  %v29_v6 = vlaneseq  ;;  %vm41_vm0 = vcmask 261120  }
   0x7   :  { %91 = vset.pattern.permute.xlu0 %v147_v0  ;;  %v39_v3 = vld [vmem:[#allocation2 + $0x10] sm:$0xff]  ;;  %57 = vmatpush.msra.mxu0 %v40_v2  ;;  %v38_v4 = vld [vmem:[#allocation2 + $0x8] sm:$0xff]  ;;  %v37_v5 = vld [vmem:[#allocation2] sm:$0xff]  ;;  %v148_v9 = vmov 0.0   ;;  %s149_s1 = smov [#allocation5]   ;;  %s73_s20 = sshll.u32 %s176_s2, 4  ;;  %s74_s20 = int_to_ptr.hbm [resolvable:$true] %s73_s20 }
   0x8   :  { %32 = vperm.xlu0 %91, %v28_v1   ;;  %v30_v7 = vand.u32 127, %v29_v6  ;;  %s71_s18 = sshll.u32 %s149_s1, 4  ;;  %s72_s18 = int_to_ptr.vmem [resolvable:$true] %s71_s18 }
   0x9   :  { %58 = vmatpush.msra.mxu0 %v39_v3 }
   0xb   :  { %59 = vmatpush.msra.mxu0 %v38_v4 }
   0xd   :  { %60 = vmatpush.msra.mxu0 %v37_v5 }
  0x7a   :  { %v33_v8 = vpop.permute.xlu0 %32 }
  0x7b   :  { %vm34_vm1 = vcmp.eq.s32.totalorder %v30_v7, %v33_v8 }
  0x7c   :  { %v83_v10 = vsel %vm34_vm1, 1.0, %v148_v9 }
  0x7d   :  { %84 = vmatmul.msk.f32.vlgmr.msra.gmra.mxu0 %vm41_vm0, %v83_v10 }
  0xfa   :  { %v62_v11 = vpop.f32.mrf.mxu0 }
  0xfb   :  { %65 = vst [vmem:[#allocation5] sm:$0xff] %v62_v11 }
  0xfc   :  { %76 = dma.vmem_to_hbm [thread:$0]  %s72_s18, 128, %s74_s20, [#allocation4]  }
  0xfd   :  { %142 = dma.done.wait [#allocation4], 128  }
  0xfe   :  { %143 = vsyncadd [#allocation4], 4294967168 }
  0xff   :  { %81 = vsyncpa [#allocation3], 1 }
 0x100   :  { %82 = vsyncpa [#allocation4], 1 }

</bundles_post_ra>
